<compile_context>
chip_gen: v6e
topology: v6e:2x2x1
jax: 0.10.0
libtpu: 0.0.40
codegen_flags: <defaults>
</compile_context>

<pallas_src>
import jax
import jax.numpy as jnp
from jax import lax
from jax.experimental import pallas as pl
from jax.experimental.pallas import tpu as pltpu


# ----------------------------- tiled linear --------------------------------

def _linear_kernel(x_ref, w_ref, b_ref, o_ref):
    o_ref[...] = (
        jnp.dot(x_ref[...], w_ref[...], preferred_element_type=jnp.float32)
        + b_ref[...]
    ).astype(o_ref.dtype)


def _row_tile(m, tile_m=512):
    if m <= tile_m:
        return m
    return max(8, (tile_m // 8) * 8)


def linear(x2d, w, b, tile_m=512):
    """y = x2d @ w + b, tiled over rows (w is (d_in, d_out))."""
    M, d_in = x2d.shape
    d_out = w.shape[1]
    tm = _row_tile(M, tile_m)
    return pl.pallas_call(
        _linear_kernel,
        out_shape=jax.ShapeDtypeStruct((M, d_out), jnp.float32),
        grid_spec=pltpu.PrefetchScalarGridSpec(
            num_scalar_prefetch=0,
            grid=(pl.cdiv(M, tm),),
            in_specs=[
                pl.BlockSpec((tm, d_in), lambda i: (i, 0)),
                pl.BlockSpec((d_in, d_out), lambda i: (0, 0)),  # resident
                pl.BlockSpec((1, d_out), lambda i: (0, 0)),     # resident
            ],
            out_specs=pl.BlockSpec((tm, d_out), lambda i: (i, 0)),
        ),
        compiler_params=pltpu.CompilerParams(dimension_semantics=("parallel",)),
    )(x2d, w, b.reshape(1, d_out))


# ------------------------ fused Q/K/V projection ----------------------------

def _qkv_proj_kernel(xq_ref, xk_ref, xv_ref, wq_ref, wk_ref, bq_ref, bk_ref,
                     qo_ref, ko_ref, vo_ref):
    wq = wq_ref[...]
    bq = bq_ref[...]
    qo_ref[...] = (jnp.dot(xq_ref[...], wq, preferred_element_type=jnp.float32)
                   + bq).astype(qo_ref.dtype)
    ko_ref[...] = (jnp.dot(xk_ref[...], wk_ref[...],
                           preferred_element_type=jnp.float32)
                   + bk_ref[...]).astype(ko_ref.dtype)
    # NOTE: the PyTorch module uses wq for the value projection; reproduced.
    vo_ref[...] = (jnp.dot(xv_ref[...], wq, preferred_element_type=jnp.float32)
                   + bq).astype(vo_ref.dtype)


def qkv_project(xq2d, xk2d, xv2d, wq, wk, bq, bk, tile_m=512):
    M, d = xq2d.shape
    assert xk2d.shape[0] == M and xv2d.shape[0] == M
    tm = _row_tile(M, tile_m)
    row = pl.BlockSpec((tm, d), lambda i: (i, 0))
    wspec = pl.BlockSpec((d, d), lambda i: (0, 0))
    bspec = pl.BlockSpec((1, d), lambda i: (0, 0))
    shp = jax.ShapeDtypeStruct((M, d), jnp.float32)
    return pl.pallas_call(
        _qkv_proj_kernel,
        out_shape=(shp, shp, shp),
        grid_spec=pltpu.PrefetchScalarGridSpec(
            num_scalar_prefetch=0,
            grid=(pl.cdiv(M, tm),),
            in_specs=[row, row, row, wspec, wspec, bspec, bspec],
            out_specs=[row, row, row],
        ),
        compiler_params=pltpu.CompilerParams(dimension_semantics=("parallel",)),
    )(xq2d, xk2d, xv2d, wq, wk, bq.reshape(1, d), bk.reshape(1, d))


# ------------------------------ attention -----------------------------------

def _make_attn_kernel(num_heads, depth):
    scale = 1.0 / float(depth) ** 0.5

    def kernel(q_ref, k_ref, v_ref, m_ref, o_ref, aw_ref):
        q = q_ref[0] * scale                 # (Sq, d_model); scale folded into q
        k = k_ref[0]
        v = v_ref[0]
        neg = m_ref[0] * (-1000000000.0)     # (Sq, Sk), shared across heads
        outs = []
        for h in range(num_heads):           # static, small H
            sl = slice(h * depth, (h + 1) * depth)
            qh = q[:, sl]
            kh = k[:, sl]
            vh = v[:, sl]
            # contract last dims directly (no materialized k.T)
            logits = lax.dot_general(
                qh, kh, (((1,), (1,)), ((), ())),
                preferred_element_type=jnp.float32) + neg
            mx = jnp.max(logits, axis=-1, keepdims=True)
            e = jnp.exp(logits - mx)
            w = e * pl.reciprocal(jnp.sum(e, axis=-1, keepdims=True), approx=True)
            aw_ref[0, h] = w.astype(aw_ref.dtype)
            outs.append(jnp.dot(w, vh, preferred_element_type=jnp.float32))
        # one lane-dense store of the full (Sq, d_model) slab
        o_ref[0] = jnp.concatenate(outs, axis=-1).astype(o_ref.dtype)

    return kernel


def _normalize_mask(mask, B, Sq, Sk):
    """Return (mask3, Bm): mask3 has shape (Bm, Sq, Sk) with Bm in {1, B}."""
    if mask is None:
        return jnp.zeros((1, Sq, Sk), jnp.float32), 1
    m = jnp.asarray(mask, jnp.float32)
    while m.ndim < 4:
        m = m[None]
    if m.shape[-3] != 1:
        # TODO(synk): head-varying masks would need a per-(b,h) mask spec; the
        # documented padding / look-ahead masks are head-invariant.
        raise NotImplementedError("per-head masks not supported")
    m = m[..., 0, :, :]                      # drop head dim
    m = m.reshape((-1,) + m.shape[-2:])      # (b?, sq?, sk?)
    assert m.shape[0] in (1, B)
    Bm = B if m.shape[0] != 1 else 1
    m = jnp.broadcast_to(m, (Bm, Sq, Sk))
    return m, Bm


def multi_head_attention_pallas(qp, kp, vp, mask, num_heads):
    """qp: (B,Sq,d_model), kp/vp: (B,Sk,d_model) -> ((B,Sq,d_model), (B,H,Sq,Sk))."""
    B, Sq, d_model = qp.shape
    Sk = kp.shape[1]
    depth = d_model // num_heads
    mask3, Bm = _normalize_mask(mask, B, Sq, Sk)
    if Bm > 1:
        mask_map = lambda b: (b, 0, 0)
    else:
        mask_map = lambda b: (0, 0, 0)       # mask DMA'd once, stays resident

    out, attn_w = pl.pallas_call(
        _make_attn_kernel(num_heads, depth),
        out_shape=(
            jax.ShapeDtypeStruct((B, Sq, d_model), jnp.float32),
            jax.ShapeDtypeStruct((B, num_heads, Sq, Sk), jnp.float32),
        ),
        grid_spec=pltpu.PrefetchScalarGridSpec(
            num_scalar_prefetch=0,
            grid=(B,),
            in_specs=[
                pl.BlockSpec((1, Sq, d_model), lambda b: (b, 0, 0)),
                pl.BlockSpec((1, Sk, d_model), lambda b: (b, 0, 0)),
                pl.BlockSpec((1, Sk, d_model), lambda b: (b, 0, 0)),
                pl.BlockSpec((1, Sq, Sk), mask_map),
            ],
            out_specs=[
                pl.BlockSpec((1, Sq, d_model), lambda b: (b, 0, 0)),
                pl.BlockSpec((1, num_heads, Sq, Sk), lambda b: (b, 0, 0, 0)),
            ],
        ),
        compiler_params=pltpu.CompilerParams(dimension_semantics=("parallel",)),
    )(qp, kp, vp, mask3)
    return out, attn_w


# ------------------------------ Module glue ---------------------------------

class MultiHeadAttention:
    def __init__(self, d_model, num_heads, key):
        assert d_model % num_heads == 0
        self.d_model = d_model
        self.num_heads = num_heads
        self.depth = d_model // num_heads

        keys = jax.random.split(key, 8)
        bound = 1.0 / float(d_model) ** 0.5

        def init_linear(kw, kb):
            # torch.nn.Linear stores weight as (out, in); we keep (in, out)
            # so kernels compute x @ W_T directly.
            w = jax.random.uniform(kw, (d_model, d_model), jnp.float32, -bound, bound)
            b = jax.random.uniform(kb, (d_model,), jnp.float32, -bound, bound)
            return w, b

        self.wq_w, self.wq_b = init_linear(keys[0], keys[1])
        self.wk_w, self.wk_b = init_linear(keys[2], keys[3])
        self.wv_w, self.wv_b = init_linear(keys[4], keys[5])  # unused (module uses wq for V)
        self.wo_w, self.wo_b = init_linear(keys[6], keys[7])

    def __call__(self, q, k, v, mask):
        B, Sq, d = q.shape
        Sk = k.shape[1]
        Sv = v.shape[1]

        if Sq == Sk == Sv:
            qp, kp, vp = qkv_project(
                q.reshape(B * Sq, d), k.reshape(B * Sk, d), v.reshape(B * Sv, d),
                self.wq_w, self.wk_w, self.wq_b, self.wk_b)
        else:
            qp = linear(q.reshape(B * Sq, d), self.wq_w, self.wq_b)
            kp = linear(k.reshape(B * Sk, d), self.wk_w, self.wk_b)
            vp = linear(v.reshape(B * Sv, d), self.wq_w, self.wq_b)  # module quirk

        qp = qp.reshape(B, Sq, d)
        kp = kp.reshape(B, Sk, d)
        vp = vp.reshape(B, Sv, d)

        attn_out, attn_w = multi_head_attention_pallas(qp, kp, vp, mask, self.num_heads)

        out = linear(attn_out.reshape(B * Sq, d), self.wo_w, self.wo_b).reshape(B, Sq, d)
        return out, attn_w


# --------------------------- pure-JAX reference ------------------------------

def reference_forward(mha, q, k, v, mask):
    B, Sq, _ = q.shape
    qp = q @ mha.wq_w + mha.wq_b
    kp = k @ mha.wk_w + mha.wk_b
    vp = v @ mha.wq_w + mha.wq_b          # module quirk: wq for values

    def split(x):
        return jnp.transpose(x.reshape(B, -1, mha.num_heads, mha.depth), (0, 2, 1, 3))

    qh, kh, vh = split(qp), split(kp), split(vp)
    logits = jnp.einsum("bhqd,bhkd->bhqk", qh, kh) / jnp.sqrt(jnp.float32(mha.depth))
    if mask is not None:
        logits = logits + mask * (-1000000000.0)
    w = jax.nn.softmax(logits, axis=-1)
    o = jnp.einsum("bhqk,bhkd->bhqd", w, vh)
    o = jnp.transpose(o, (0, 2, 1, 3)).reshape(B, Sq, mha.d_model)
    return o @ mha.wo_w + mha.wo_b, w


# ---------------------------------- main -------------------------------------

if __name__ == "__main__":
    key = jax.random.PRNGKey(0)
    k_param, k_q, k_k, k_v = jax.random.split(key, 4)

    batch, seq, d_model, num_heads = 2, 8, 32, 4

    mha = MultiHeadAttention(d_model, num_heads, k_param)

    q = jax.random.normal(k_q, (batch, seq, d_model), jnp.float32)
    k = jax.random.normal(k_k, (batch, seq, d_model), jnp.float32)
    v = jax.random.normal(k_v, (batch, seq, d_model), jnp.float32)

    # look-ahead mask broadcastable to (..., seq_q, seq_k): 1 where masked
    mask = jnp.triu(jnp.ones((seq, seq), jnp.float32), k=1)[None, None, :, :]

    out, attn_w = mha(q, k, v, mask)
    jax.block_until_ready((out, attn_w))

    ref_out, ref_w = reference_forward(mha, q, k, v, mask)
    # tolerances account for pl.reciprocal(approx=True) in the softmax denom
    assert jnp.allclose(out, ref_out, atol=5e-3, rtol=5e-3)
    assert jnp.allclose(attn_w, ref_w, atol=5e-3, rtol=5e-3)

    print("KERNEL_OK")
</pallas_src>

<mosaic_0001>
module attributes {stable_mosaic.version = 11 : i64} {
  func.func @_qkv_proj_kernel(%arg0: i32, %arg1: memref<16x32xf32, #tpu.memory_space<vmem>>, %arg2: memref<16x32xf32, #tpu.memory_space<vmem>>, %arg3: memref<16x32xf32, #tpu.memory_space<vmem>>, %arg4: memref<32x32xf32, #tpu.memory_space<vmem>>, %arg5: memref<32x32xf32, #tpu.memory_space<vmem>>, %arg6: memref<1x32xf32, #tpu.memory_space<vmem>>, %arg7: memref<1x32xf32, #tpu.memory_space<vmem>>, %arg8: memref<16x32xf32, #tpu.memory_space<vmem>>, %arg9: memref<16x32xf32, #tpu.memory_space<vmem>>, %arg10: memref<16x32xf32, #tpu.memory_space<vmem>>) attributes {dimension_semantics = [#tpu.dimension_semantics<parallel>], iteration_bounds = array<i64: 1>, scalar_prefetch = 0 : i64, scratch_operands = 0 : i64, tpu.core_type = #tpu.core_type<tc>, window_params = [{transform_indices = @transform_0, window_bounds = array<i64: 16, 32>}, {transform_indices = @transform_1, window_bounds = array<i64: 16, 32>}, {transform_indices = @transform_2, window_bounds = array<i64: 16, 32>}, {pipeline_mode = #tpu.pipeline_mode<synchronous>, transform_indices = @transform_3, window_bounds = array<i64: 32, 32>}, {pipeline_mode = #tpu.pipeline_mode<synchronous>, transform_indices = @transform_4, window_bounds = array<i64: 32, 32>}, {pipeline_mode = #tpu.pipeline_mode<synchronous>, transform_indices = @transform_5, window_bounds = array<i64: 1, 32>}, {pipeline_mode = #tpu.pipeline_mode<synchronous>, transform_indices = @transform_6, window_bounds = array<i64: 1, 32>}, {transform_indices = @transform_7, window_bounds = array<i64: 16, 32>}, {transform_indices = @transform_8, window_bounds = array<i64: 16, 32>}, {transform_indices = @transform_9, window_bounds = array<i64: 16, 32>}]} {
    %c0 = arith.constant 0 : index
    %c0_0 = arith.constant 0 : index
    %0 = vector.load %arg4[%c0, %c0_0] : memref<32x32xf32, #tpu.memory_space<vmem>>, vector<32x32xf32>
    %c0_1 = arith.constant 0 : index
    %c0_2 = arith.constant 0 : index
    %1 = vector.load %arg6[%c0_1, %c0_2] : memref<1x32xf32, #tpu.memory_space<vmem>>, vector<1x32xf32>
    %c0_3 = arith.constant 0 : index
    %c0_4 = arith.constant 0 : index
    %2 = vector.load %arg1[%c0_3, %c0_4] : memref<16x32xf32, #tpu.memory_space<vmem>>, vector<16x32xf32>
    %cst = arith.constant dense<0.000000e+00> : vector<16x32xf32>
    %3 = tpu.matmul %2, %0, %cst {dimension_numbers = #tpu.dot_dimension_numbers<[1], [0], [0], [1], [0, 0, 1, 1], [], []>} : vector<16x32xf32>, vector<32x32xf32>, vector<16x32xf32> -> vector<16x32xf32>
    %4 = vector.broadcast %1 : vector<1x32xf32> to vector<16x32xf32>
    %5 = arith.addf %3, %4 : vector<16x32xf32>
    %c0_5 = arith.constant 0 : index
    %c0_6 = arith.constant 0 : index
    %6 = vector.load %arg8[%c0_5, %c0_6] : memref<16x32xf32, #tpu.memory_space<vmem>>, vector<16x32xf32>
    tpu.vector_store %arg8[%c0_5, %c0_6], %5 {strides = array<i32>} : memref<16x32xf32, #tpu.memory_space<vmem>>, vector<16x32xf32>,
    %c0_7 = arith.constant 0 : index
    %c0_8 = arith.constant 0 : index
    %7 = vector.load %arg2[%c0_7, %c0_8] : memref<16x32xf32, #tpu.memory_space<vmem>>, vector<16x32xf32>
    %c0_9 = arith.constant 0 : index
    %c0_10 = arith.constant 0 : index
    %8 = vector.load %arg5[%c0_9, %c0_10] : memref<32x32xf32, #tpu.memory_space<vmem>>, vector<32x32xf32>
    %cst_11 = arith.constant dense<0.000000e+00> : vector<16x32xf32>
    %9 = tpu.matmul %7, %8, %cst_11 {dimension_numbers = #tpu.dot_dimension_numbers<[1], [0], [0], [1], [0, 0, 1, 1], [], []>} : vector<16x32xf32>, vector<32x32xf32>, vector<16x32xf32> -> vector<16x32xf32>
    %c0_12 = arith.constant 0 : index
    %c0_13 = arith.constant 0 : index
    %10 = vector.load %arg7[%c0_12, %c0_13] : memref<1x32xf32, #tpu.memory_space<vmem>>, vector<1x32xf32>
    %11 = vector.broadcast %10 : vector<1x32xf32> to vector<16x32xf32>
    %12 = arith.addf %9, %11 : vector<16x32xf32>
    %c0_14 = arith.constant 0 : index
    %c0_15 = arith.constant 0 : index
    %13 = vector.load %arg9[%c0_14, %c0_15] : memref<16x32xf32, #tpu.memory_space<vmem>>, vector<16x32xf32>
    tpu.vector_store %arg9[%c0_14, %c0_15], %12 {strides = array<i32>} : memref<16x32xf32, #tpu.memory_space<vmem>>, vector<16x32xf32>,
    %c0_16 = arith.constant 0 : index
    %c0_17 = arith.constant 0 : index
    %14 = vector.load %arg3[%c0_16, %c0_17] : memref<16x32xf32, #tpu.memory_space<vmem>>, vector<16x32xf32>
    %cst_18 = arith.constant dense<0.000000e+00> : vector<16x32xf32>
    %15 = tpu.matmul %14, %0, %cst_18 {dimension_numbers = #tpu.dot_dimension_numbers<[1], [0], [0], [1], [0, 0, 1, 1], [], []>} : vector<16x32xf32>, vector<32x32xf32>, vector<16x32xf32> -> vector<16x32xf32>
    %16 = vector.broadcast %1 : vector<1x32xf32> to vector<16x32xf32>
    %17 = arith.addf %15, %16 : vector<16x32xf32>
    %c0_19 = arith.constant 0 : index
    %c0_20 = arith.constant 0 : index
    %18 = vector.load %arg10[%c0_19, %c0_20] : memref<16x32xf32, #tpu.memory_space<vmem>>, vector<16x32xf32>
    tpu.vector_store %arg10[%c0_19, %c0_20], %17 {strides = array<i32>} : memref<16x32xf32, #tpu.memory_space<vmem>>, vector<16x32xf32>,
    return
  }
  func.func @transform_0(%arg0: i32) -> (i32, i32) {
    %c0_i32 = arith.constant 0 : i32
    %c0_i32_0 = arith.constant 0 : i32
    return %arg0, %c0_i32 : i32, i32
  }
  func.func @transform_1(%arg0: i32) -> (i32, i32) {
    %c0_i32 = arith.constant 0 : i32
    %c0_i32_0 = arith.constant 0 : i32
    return %arg0, %c0_i32 : i32, i32
  }
  func.func @transform_2(%arg0: i32) -> (i32, i32) {
    %c0_i32 = arith.constant 0 : i32
    %c0_i32_0 = arith.constant 0 : i32
    return %arg0, %c0_i32 : i32, i32
  }
  func.func @transform_3(%arg0: i32) -> (i32, i32) {
    %c0_i32 = arith.constant 0 : i32
    %c0_i32_0 = arith.constant 0 : i32
    %c0_i32_1 = arith.constant 0 : i32
    return %c0_i32, %c0_i32_0 : i32, i32
  }
  func.func @transform_4(%arg0: i32) -> (i32, i32) {
    %c0_i32 = arith.constant 0 : i32
    %c0_i32_0 = arith.constant 0 : i32
    %c0_i32_1 = arith.constant 0 : i32
    return %c0_i32, %c0_i32_0 : i32, i32
  }
  func.func @transform_5(%arg0: i32) -> (i32, i32) {
    %c0_i32 = arith.constant 0 : i32
    %c0_i32_0 = arith.constant 0 : i32
    %c0_i32_1 = arith.constant 0 : i32
    return %c0_i32, %c0_i32_0 : i32, i32
  }
  func.func @transform_6(%arg0: i32) -> (i32, i32) {
    %c0_i32 = arith.constant 0 : i32
    %c0_i32_0 = arith.constant 0 : i32
    %c0_i32_1 = arith.constant 0 : i32
    return %c0_i32, %c0_i32_0 : i32, i32
  }
  func.func @transform_7(%arg0: i32) -> (i32, i32) {
    %c0_i32 = arith.constant 0 : i32
    %c0_i32_0 = arith.constant 0 : i32
    return %arg0, %c0_i32 : i32, i32
  }
  func.func @transform_8(%arg0: i32) -> (i32, i32) {
    %c0_i32 = arith.constant 0 : i32
    %c0_i32_0 = arith.constant 0 : i32
    return %arg0, %c0_i32 : i32, i32
  }
  func.func @transform_9(%arg0: i32) -> (i32, i32) {
    %c0_i32 = arith.constant 0 : i32
    %c0_i32_0 = arith.constant 0 : i32
    return %arg0, %c0_i32 : i32, i32
  }
}

</mosaic_0001>

<bundles_post_ra>
// kernel: tpu_custom_call.1
= control target key start
LH: loop header
LB: loop body
LE: loop exit
PB: predicated region body
PF: predicated region fallthrough
CT: control target
= control target key end

     0   :  { %15 = vsyncpa [#allocation3], 0  ;;  %s792_s0 = inlined_call_operand.hbm [shape: f32[16,32], index: 0, kind: input, shape index: {}]   ;;  %s793_s1 = inlined_call_operand.hbm [shape: f32[16,32], index: 1, kind: input, shape index: {}]   ;;  %s794_s2 = inlined_call_operand.hbm [shape: f32[16,32], index: 2, kind: input, shape index: {}]   ;;  %s795_s3 = inlined_call_operand.hbm [shape: f32[32,32], index: 3, kind: input, shape index: {}]   ;;  %s796_s4 = inlined_call_operand.hbm [shape: f32[32,32], index: 4, kind: input, shape index: {}]   ;;  %s797_s5 = inlined_call_operand.vmem [shape: f32[1,32], index: 5, kind: input, shape index: {}]   ;;  %s798_s6 = inlined_call_operand.vmem [shape: f32[1,32], index: 6, kind: input, shape index: {}]   ;;  %s799_s7 = inlined_call_operand.hbm [shape: f32[16,32], index: 7, kind: output, shape index: {0}]   ;;  %s800_s8 = inlined_call_operand.hbm [shape: f32[16,32], index: 8, kind: output, shape index: {1}]   ;;  %s801_s9 = inlined_call_operand.hbm [shape: f32[16,32], index: 9, kind: output, shape index: {2}]  }
   0x1   :  { %16 = vsyncpa [#allocation6], 0 }
   0x2   :  { %17 = vsyncpa [#allocation9], 0 }
   0x3   :  { %18 = vsyncpa [#allocation4], 0 }
   0x4   :  { %19 = vsyncpa [#allocation13], 0  ;;  %s666_s30 = smov [#allocation5]   ;;  %s667_s11 = smov [#allocation8]  }
   0x5   :  { %s37_s10 = sshll.u32 %s666_s30, 4  ;;  %s61_s12 = sshll.u32 %s667_s11, 4  ;;  %s38_s10 = int_to_ptr.vmem [resolvable:$true] %s37_s10  ;;  %s62_s12 = int_to_ptr.vmem [resolvable:$true] %s61_s12 }
   0x6   :  { %s504_s13 = scalar_lea.vmem %s38_s10, 256  ;;  %p509_p1 = scmp.lt.s32.totalorder %s38_s10, %s38_s10 }
   0x7   :  { %p505_p0 = scmp.ne.s32.totalorder %s38_s10, %s504_s13  ;;  %p510_p2 = scmp.lt.s32.totalorder %s504_s13, %s504_s13 }
   0x9   :  { %p511_p3 = por %p510_p2, %p509_p1 }
   0xb   :  { %p512_p4 = pnand %p511_p3, %p505_p0 }
   0xd   :  { %515 = shalt.err (!%p512_p4)
}
   0xe   :  { %s668_s14 = smov 128   ;;  %s669_s15 = smov 8  }
   0xf   :  { %43 = dma.hbm_to_vmem [thread:$0]  %s793_s1, 256, %s38_s10, [#allocation6], %s668_s14, %s668_s14, %s669_s15  }
  0x10   :  { %s524_s18 = scalar_lea.vmem %s62_s12, 512  ;;  %p529_p6 = scmp.lt.s32.totalorder %s62_s12, %s62_s12 }
  0x11   :  { %p525_p5 = scmp.ne.s32.totalorder %s62_s12, %s524_s18  ;;  %p530_p7 = scmp.lt.s32.totalorder %s524_s18, %s524_s18 }
  0x13   :  { %p531_p8 = por %p530_p7, %p529_p6 }
  0x15   :  { %p532_p9 = pnand %p531_p8, %p525_p5 }
  0x17   :  { %535 = shalt.err (!%p532_p9)
}
  0x18   :  { %67 = dma.hbm_to_vmem [thread:$0]  %s795_s3, 512, %s62_s12, [#allocation9], %s668_s14, %s668_s14, %s669_s15  }
  0x19   :  { %s670_s21 = smov [#allocation2]   ;;  %s671_s23 = smov [#allocation7]  }
  0x1a   :  { %s25_s22 = sshll.u32 %s670_s21, 4  ;;  %s49_s24 = sshll.u32 %s671_s23, 4  ;;  %s26_s22 = int_to_ptr.vmem [resolvable:$true] %s25_s22  ;;  %s50_s24 = int_to_ptr.vmem [resolvable:$true] %s49_s24 }
  0x1b   :  { %s544_s1 = scalar_lea.vmem %s26_s22, 256  ;;  %p549_p11 = scmp.lt.s32.totalorder %s26_s22, %s26_s22 }
  0x1c   :  { %p545_p10 = scmp.ne.s32.totalorder %s26_s22, %s544_s1  ;;  %p550_p12 = scmp.lt.s32.totalorder %s544_s1, %s544_s1 }
  0x1e   :  { %p551_p13 = por %p550_p12, %p549_p11 }
  0x20   :  { %p552_p0 = pnand %p551_p13, %p545_p10 }
  0x22   :  { %555 = shalt.err (!%p552_p0)
}
  0x23   :  { %31 = dma.hbm_to_vmem [thread:$0]  %s792_s0, 256, %s26_s22, [#allocation3], %s668_s14, %s668_s14, %s669_s15  }
  0x24   :  { %s564_s3 = scalar_lea.vmem %s50_s24, 256  ;;  %p569_p2 = scmp.lt.s32.totalorder %s50_s24, %s50_s24 }
  0x25   :  { %p565_p1 = scmp.ne.s32.totalorder %s50_s24, %s564_s3  ;;  %p570_p3 = scmp.lt.s32.totalorder %s564_s3, %s564_s3 }
  0x27   :  { %p571_p4 = por %p570_p3, %p569_p2 }
  0x29   :  { %p572_p5 = pnand %p571_p4, %p565_p1 }
  0x2b   :  { %575 = shalt.err (!%p572_p5)
}
  0x2c   :  { %55 = dma.hbm_to_vmem [thread:$0]  %s794_s2, 256, %s50_s24, [#allocation6], %s668_s14, %s668_s14, %s669_s15  }
  0x2d   :  { %s672_s29 = smov [#allocation10]  }
  0x2e   :  { %s73_s30 = sshll.u32 %s672_s29, 4  ;;  %s74_s30 = int_to_ptr.vmem [resolvable:$true] %s73_s30 }
  0x2f   :  { %s584_s10 = scalar_lea.vmem %s74_s30, 512  ;;  %p589_p7 = scmp.lt.s32.totalorder %s74_s30, %s74_s30 }
  0x30   :  { %p585_p6 = scmp.ne.s32.totalorder %s74_s30, %s584_s10  ;;  %p590_p8 = scmp.lt.s32.totalorder %s584_s10, %s584_s10 }
  0x32   :  { %p591_p9 = por %p590_p8, %p589_p7 }
  0x34   :  { %p592_p10 = pnand %p591_p9, %p585_p6 }
  0x36   :  { %595 = shalt.err (!%p592_p10)
}
  0x37   :  { %79 = dma.hbm_to_vmem [thread:$0]  %s796_s4, 512, %s74_s30, [#allocation9], %s668_s14, %s668_s14, %s669_s15  }
  0x38   :  { %656 = dma.done.wait [#allocation3], 256  }
  0x39   :  { %657 = vsyncadd [#allocation3], 4294967040 }
  0x3a   :  { %658 = dma.done.wait [#allocation6], 512  }
  0x3b   :  { %659 = vsyncadd [#allocation6], 4294966784 }
  0x3c   :  { %660 = dma.done.wait [#allocation9], 1024  }
  0x3d   :  { %661 = vsyncadd [#allocation9], 4294966272  ;;  %v102_v0 = vld [vmem:[#allocation8 + $0x18] sm:$0xff]  ;;  %v101_v1 = vld [vmem:[#allocation8 + $0x10] sm:$0xff]  ;;  %vm112_vm0 = vcmask 261120   ;;  %s673_s12 = smov [#allocation11]  }
  0x3e   :  { %453 = vmatprep.subr.mxu0 %v102_v0  ;;  %v201_v2 = vld [vmem:[#allocation10 + $0x18] sm:$0xff]  ;;  %v104_v3 = vld [vmem:[#allocation2] sm:$0xff]  ;;  %v100_v4 = vld [vmem:[#allocation8 + $0x8] sm:$0xff]  ;;  %s382_s13 = sshll.u32 %s673_s12, 4  ;;  %s674_s18 = smov [#allocation12]   ;;  %s383_s13 = int_to_ptr.vmem [resolvable:$true] %s382_s13 }
  0x3f   :  { %454 = vmatpush3.msra.mxu0 %v102_v0  ;;  %464 = vmatprep.subr.mxu1 %v201_v2  ;;  %v200_v5 = vld [vmem:[#allocation10 + $0x10] sm:$0xff]  ;;  %v99_v6 = vld [vmem:[#allocation8] sm:$0xff]  ;;  %v199_v7 = vld [vmem:[#allocation10 + $0x8] sm:$0xff]  ;;  %s394_s19 = sshll.u32 %s674_s18, 4  ;;  %p601_p12 = scmp.lt.s32.totalorder %s383_s13, %s383_s13  ;;  %s395_s19 = int_to_ptr.vmem [resolvable:$true] %s394_s19 }
  0x40   :  { %455 = vmatprep.subr.mxu0 %v101_v1  ;;  %465 = vmatpush3.msra.mxu1 %v201_v2  ;;  %v105_v8 = vld [vmem:[#allocation2 + $0x8] sm:$0xff]  ;;  %v198_v9 = vld [vmem:[#allocation10] sm:$0xff]  ;;  %v197_v11 = vld [vmem:[#allocation5 + $0x8] sm:$0xff] }
  0x41   :  { %456 = vmatpush3.msra.mxu0 %v101_v1  ;;  %461 = vmatprep.mubr.msk.f32.mxu0 %vm112_vm0, %v104_v3  ;;  %v196_v10 = vld [vmem:[#allocation5] sm:$0xff]  ;;  %v292_v12 = vld [vmem:[#allocation7] sm:$0xff]  ;;  %v293_v13 = vld [vmem:[#allocation7 + $0x8] sm:$0xff] }
  0x42   :  { %457 = vmatprep.subr.mxu0 %v100_v4  ;;  %466 = vmatprep.subr.mxu1 %v200_v5  ;;  %v427_v14 = vld [vmem:[%s797_s5] ss:$0 sm:$0xff]  ;;  %s596_s5 = scalar_lea.vmem %s383_s13, 256 }
  0x43   :  { %458 = vmatpush3.msra.mxu0 %v100_v4  ;;  %467 = vmatpush3.msra.mxu1 %v200_v5  ;;  %v430_v18 = vld [vmem:[%s798_s6] ss:$0 sm:$0xff]  ;;  %p597_p11 = scmp.ne.s32.totalorder %s383_s13, %s596_s5  ;;  %p602_p13 = scmp.lt.s32.totalorder %s596_s5, %s596_s5 }
  0x44   :  { %459 = vmatprep.subr.mxu0 %v99_v6  ;;  %468 = vmatprep.subr.mxu1 %v199_v7 }
  0x45   :  { %460 = vmatpush3.msra.mxu0 %v99_v6  ;;  %469 = vmatpush3.msra.mxu1 %v199_v7  ;;  %p603_p0 = por %p602_p13, %p601_p12 }
  0x46   :  { %462 = vmatmul.mubr.msk.f32.vlgmr.msra.gmra.mxu0 %vm112_vm0, %v105_v8  ;;  %475 = vmatprep.subr.mxu0 %v102_v0 }
  0x47   :  { %476 = vmatpush3.msra.mxu0 %v102_v0  ;;  %470 = vmatprep.subr.mxu1 %v198_v9  ;;  %p604_p1 = pnand %p603_p0, %p597_p11 }
  0x48   :  { %477 = vmatprep.subr.mxu0 %v101_v1  ;;  %471 = vmatpush3.msra.mxu1 %v198_v9 }
  0x49   :  { %478 = vmatpush3.msra.mxu0 %v101_v1  ;;  %472 = vmatprep.mubr.msk.f32.mxu1 %vm112_vm0, %v196_v10 }
  0x4a   :  { %479 = vmatprep.subr.mxu0 %v100_v4  ;;  %473 = vmatmul.mubr.msk.f32.vlgmr.msra.gmra.mxu1 %vm112_vm0, %v197_v11 }
  0x4b   :  { %480 = vmatpush3.msra.mxu0 %v100_v4  ;;  %483 = vmatprep.mubr.msk.f32.mxu0 %vm112_vm0, %v292_v12 }
  0x4c   :  { %481 = vmatprep.subr.mxu0 %v99_v6 }
  0x4d   :  { %482 = vmatpush3.msra.mxu0 %v99_v6 }
  0x4e   :  { %484 = vmatmul.mubr.msk.f32.vlgmr.msra.gmra.mxu0 %vm112_vm0, %v293_v13 }
 0x106   :  { %v463_v15 = vpop.f32.mrf.mxu0 }
 0x107   :  { %v191_v16 = vadd.f32 %v463_v15, %v427_v14 }
 0x108   :  { %v185_v17 = vpop.f32.mrf.mxu0 }
 0x109   :  { %195 = vst.msk [vmem:[#allocation11 + $0x8] sm:$0xff] %vm112_vm0, %v191_v16  ;;  %v186_v19 = vadd.f32 %v427_v14, %v185_v17 }
 0x10a   :  { %v474_v20 = vpop.f32.mrf.mxu1 }
 0x10b   :  { %194 = vst.msk [vmem:[#allocation11] sm:$0xff] %vm112_vm0, %v186_v19  ;;  %v287_v21 = vadd.f32 %v474_v20, %v430_v18 }
 0x10c   :  { %v281_v22 = vpop.f32.mrf.mxu1 }
 0x10d   :  { %607 = shalt.err (!%p604_p1)
}
 0x10e   :  { %388 = dma.vmem_to_hbm [thread:$0]  %s383_s13, 256, %s799_s7, [#allocation4], %s668_s14, %s668_s14, %s669_s15   ;;  %291 = vst.msk [vmem:[#allocation12 + $0x8] sm:$0xff] %vm112_vm0, %v287_v21  ;;  %v282_v23 = vadd.f32 %v430_v18, %v281_v22  ;;  %v485_v24 = vpop.f32.mrf.mxu0 }
 0x10f   :  { %s675_s21 = smov [#allocation14]   ;;  %v372_v25 = vadd.f32 %v485_v24, %v427_v14  ;;  %s616_s23 = scalar_lea.vmem %s395_s19, 256 }
 0x110   :  { %s406_s22 = sshll.u32 %s675_s21, 4  ;;  %290 = vst.msk [vmem:[#allocation12] sm:$0xff] %vm112_vm0, %v282_v23  ;;  %v366_v26 = vpop.f32.mrf.mxu0  ;;  %p617_p2 = scmp.ne.s32.totalorder %s395_s19, %s616_s23  ;;  %s407_s22 = int_to_ptr.vmem [resolvable:$true] %s406_s22 }
 0x111   :  { %p621_p3 = scmp.lt.s32.totalorder %s395_s19, %s395_s19  ;;  %p622_p4 = scmp.lt.s32.totalorder %s616_s23, %s616_s23 }
 0x113   :  { %p623_p5 = por %p622_p4, %p621_p3 }
 0x115   :  { %p624_p6 = pnand %p623_p5, %p617_p2 }
 0x117   :  { %627 = shalt.err (!%p624_p6)
}
 0x118   :  { %400 = dma.vmem_to_hbm [thread:$0]  %s395_s19, 256, %s800_s8, [#allocation13], %s668_s14, %s668_s14, %s669_s15   ;;  %376 = vst.msk [vmem:[#allocation14 + $0x8] sm:$0xff] %vm112_vm0, %v372_v25  ;;  %v367_v27 = vadd.f32 %v427_v14, %v366_v26 }
 0x119   :  { %s636_s1 = scalar_lea.vmem %s407_s22, 256  ;;  %p641_p8 = scmp.lt.s32.totalorder %s407_s22, %s407_s22 }
 0x11a   :  { %375 = vst.msk [vmem:[#allocation14] sm:$0xff] %vm112_vm0, %v367_v27  ;;  %p637_p7 = scmp.ne.s32.totalorder %s407_s22, %s636_s1  ;;  %p642_p9 = scmp.lt.s32.totalorder %s636_s1, %s636_s1 }
 0x11c   :  { %p643_p10 = por %p642_p9, %p641_p8 }
 0x11e   :  { %p644_p11 = pnand %p643_p10, %p637_p7 }
 0x120   :  { %647 = shalt.err (!%p644_p11)
}
 0x121   :  { %412 = dma.vmem_to_hbm [thread:$0]  %s407_s22, 256, %s801_s9, [#allocation13], %s668_s14, %s668_s14, %s669_s15  }
 0x122   :  { %662 = dma.done.wait [#allocation4], 256  }
 0x123   :  { %663 = vsyncadd [#allocation4], 4294967040 }
 0x124   :  { %664 = dma.done.wait [#allocation13], 512  }
 0x125   :  { %665 = vsyncadd [#allocation13], 4294966784 }
 0x126   :  { %422 = vsyncpa [#allocation3], 1 }
 0x127   :  { %423 = vsyncpa [#allocation6], 1 }
 0x128   :  { %424 = vsyncpa [#allocation9], 1 }
 0x129   :  { %425 = vsyncpa [#allocation4], 1 }
 0x12a   :  { %426 = vsyncpa [#allocation13], 1 }

</bundles_post_ra>
